<compile_context>
chip_gen: v6e
topology: v6e:2x2x1
jax: 0.10.0
libtpu: 0.0.40
codegen_flags: <defaults>
</compile_context>

<pallas_src>
import jax
import jax.numpy as jnp
from jax.experimental import pallas as pl
from jax.experimental.pallas import tpu as pltpu


def _se_block_kernel(x_ref, w1t_ref, b1_ref, w2t_ref, b2_ref, o_ref):
    x = x_ref[...].astype(jnp.float32)               # (Bb, C, T)
    # ---- squeeze: global average pool over time -> lane-dense (Bb, C) row ----
    pooled = jnp.mean(x, axis=-1)                    # (Bb, C)
    # ---- excitation: two lane-dense FCs (1x1 convs), MXU matmuls ----
    z = jnp.dot(pooled, w1t_ref[...],
                preferred_element_type=jnp.float32) + b1_ref[...]
    z = jnp.maximum(z, 0.0)                          # (Bb, bottleneck)
    s = jnp.dot(z, w2t_ref[...],
                preferred_element_type=jnp.float32) + b2_ref[...]
    s = jax.nn.sigmoid(s)                            # (Bb, C)
    # ---- scale: broadcast channel gates over the time (lane) axis ----
    o_ref[...] = (x * s[:, :, None]).astype(o_ref.dtype)


def _pick_block_b(B, C, T, budget_bytes=8 * 1024 * 1024):
    """Largest divisor of B whose (Bb, C, T) f32 block fits the VMEM budget,
    while keeping the grid length >= 2 so both v7x TensorCores get work."""
    per_b = C * T * 4
    best = 1
    for d in range(1, B + 1):
        if B % d != 0:
            continue
        if d * per_b > budget_bytes:
            continue
        if B >= 2 and B // d < 2:
            continue
        best = d
    return best


def se_block_forward(x, w1, b1, w2, b2, *, block_b=None):
    """x: (B, C, T); w1: (bottleneck, C); b1: (bottleneck,);
    w2: (C, bottleneck); b2: (C,)."""
    B, C, T = x.shape
    bottleneck = w1.shape[0]

    if block_b is None:
        block_b = _pick_block_b(B, C, T)
    assert B % block_b == 0
    grid = (B // block_b,)

    # Layout plumbing in the wrapper: transpose weights / reshape biases so the
    # in-kernel FCs are row-major (lane-dense) matmuls.
    w1t = jnp.asarray(w1, jnp.float32).T             # (C, bottleneck)
    b1r = jnp.asarray(b1, jnp.float32).reshape(1, bottleneck)
    w2t = jnp.asarray(w2, jnp.float32).T             # (bottleneck, C)
    b2r = jnp.asarray(b2, jnp.float32).reshape(1, C)

    def full_spec(a):
        n = a.ndim
        return pl.BlockSpec(a.shape, lambda b, _n=n: (0,) * _n)

    cost = pl.CostEstimate(
        flops=int(B * (2 * C * T + 4 * C * bottleneck)),
        transcendentals=int(B * C),
        bytes_accessed=int(2 * B * C * T * 4
                           + (2 * C * bottleneck + C + bottleneck) * 4),
    )

    return pl.pallas_call(
        _se_block_kernel,
        out_shape=jax.ShapeDtypeStruct((B, C, T), x.dtype),
        grid=grid,
        in_specs=[pl.BlockSpec((block_b, C, T), lambda b: (b, 0, 0)),
                  full_spec(w1t), full_spec(b1r),
                  full_spec(w2t), full_spec(b2r)],
        out_specs=pl.BlockSpec((block_b, C, T), lambda b: (b, 0, 0)),
        compiler_params=pltpu.CompilerParams(
            dimension_semantics=("parallel",),
            vmem_limit_bytes=48 * 1024 * 1024),
        cost_estimate=cost,
    )(x, w1t, b1r, w2t, b2r)
    # TODO(synk): if a single (1, C, T) slab ever exceeds the VMEM budget, add
    # a two-pass variant (pooled pass over T tiles, then a scale pass) instead
    # of whole-T batch blocks.


def se_block_ref(x, w1, b1, w2, b2):
    """Pure-JAX reference matching the PyTorch SEBlock forward."""
    pooled = jnp.mean(x, axis=2, keepdims=True)                       # (B, C, 1)
    z = jnp.einsum("oc,bci->boi", w1, pooled) + b1[None, :, None]     # (B, bn, 1)
    z = jnp.maximum(z, 0.0)
    s = jax.nn.sigmoid(jnp.einsum("co,boi->bci", w2, z) + b2[None, :, None])
    return x * s


if __name__ == "__main__":
    B, C, T, bottleneck = 4, 64, 128, 32
    f32 = jnp.float32

    key = jax.random.PRNGKey(0)
    k0, k1, k2, k3, k4 = jax.random.split(key, 5)

    x = jax.random.normal(k0, (B, C, T), dtype=f32)
    w1 = (0.1 * jax.random.normal(k1, (bottleneck, C))).astype(f32)   # Conv1d(C->bn, k=1)
    b1 = (0.1 * jax.random.normal(k2, (bottleneck,))).astype(f32)
    w2 = (0.1 * jax.random.normal(k3, (C, bottleneck))).astype(f32)   # Conv1d(bn->C, k=1)
    b2 = (0.1 * jax.random.normal(k4, (C,))).astype(f32)

    out = se_block_forward(x, w1, b1, w2, b2)
    out = jax.block_until_ready(out)

    ref = se_block_ref(x, w1, b1, w2, b2)
    assert out.shape == (B, C, T)
    max_err = float(jnp.max(jnp.abs(out - ref)))
    assert jnp.allclose(out, ref, atol=1e-4, rtol=1e-4), f"max abs err = {max_err}"
    print("KERNEL_OK")
</pallas_src>

<mosaic_0001>
module attributes {stable_mosaic.version = 11 : i64} {
  func.func @_se_block_kernel(%arg0: i32, %arg1: memref<2x64x128xf32, #tpu.memory_space<vmem>>, %arg2: memref<64x32xf32, #tpu.memory_space<vmem>>, %arg3: memref<1x32xf32, #tpu.memory_space<vmem>>, %arg4: memref<32x64xf32, #tpu.memory_space<vmem>>, %arg5: memref<1x64xf32, #tpu.memory_space<vmem>>, %arg6: memref<2x64x128xf32, #tpu.memory_space<vmem>>) attributes {dimension_semantics = [#tpu.dimension_semantics<parallel>], iteration_bounds = array<i64: 2>, scalar_prefetch = 0 : i64, scratch_operands = 0 : i64, tpu.core_type = #tpu.core_type<tc>, window_params = [{transform_indices = @transform_0, window_bounds = array<i64: 2, 64, 128>}, {pipeline_mode = #tpu.pipeline_mode<synchronous>, transform_indices = @transform_1, window_bounds = array<i64: 64, 32>}, {pipeline_mode = #tpu.pipeline_mode<synchronous>, transform_indices = @transform_2, window_bounds = array<i64: 1, 32>}, {pipeline_mode = #tpu.pipeline_mode<synchronous>, transform_indices = @transform_3, window_bounds = array<i64: 32, 64>}, {pipeline_mode = #tpu.pipeline_mode<synchronous>, transform_indices = @transform_4, window_bounds = array<i64: 1, 64>}, {transform_indices = @transform_5, window_bounds = array<i64: 2, 64, 128>}]} {
    %c0 = arith.constant 0 : index
    %c0_0 = arith.constant 0 : index
    %c0_1 = arith.constant 0 : index
    %0 = vector.load %arg1[%c0, %c0_0, %c0_1] : memref<2x64x128xf32, #tpu.memory_space<vmem>>, vector<2x64x128xf32>
    %cst = arith.constant dense<0.000000e+00> : vector<2x64xf32>
    %1 = vector.multi_reduction <add>, %0, %cst [2] : vector<2x64x128xf32> to vector<2x64xf32>
    %cst_2 = arith.constant 1.280000e+02 : f32
    %2 = vector.broadcast %cst_2 : f32 to vector<2x64xf32>
    %3 = arith.divf %1, %2 : vector<2x64xf32>
    %c0_3 = arith.constant 0 : index
    %c0_4 = arith.constant 0 : index
    %4 = vector.load %arg2[%c0_3, %c0_4] : memref<64x32xf32, #tpu.memory_space<vmem>>, vector<64x32xf32>
    %cst_5 = arith.constant dense<0.000000e+00> : vector<2x32xf32>
    %5 = tpu.matmul %3, %4, %cst_5 {dimension_numbers = #tpu.dot_dimension_numbers<[1], [0], [0], [1], [0, 0, 1, 1], [], []>} : vector<2x64xf32>, vector<64x32xf32>, vector<2x32xf32> -> vector<2x32xf32>
    %c0_6 = arith.constant 0 : index
    %c0_7 = arith.constant 0 : index
    %6 = vector.load %arg3[%c0_6, %c0_7] : memref<1x32xf32, #tpu.memory_space<vmem>>, vector<1x32xf32>
    %7 = vector.broadcast %6 : vector<1x32xf32> to vector<2x32xf32>
    %8 = arith.addf %5, %7 : vector<2x32xf32>
    %cst_8 = arith.constant 0.000000e+00 : f32
    %9 = vector.broadcast %cst_8 : f32 to vector<2x32xf32>
    %10 = arith.maximumf %8, %9 : vector<2x32xf32>
    %c0_9 = arith.constant 0 : index
    %c0_10 = arith.constant 0 : index
    %11 = vector.load %arg4[%c0_9, %c0_10] : memref<32x64xf32, #tpu.memory_space<vmem>>, vector<32x64xf32>
    %cst_11 = arith.constant dense<0.000000e+00> : vector<2x64xf32>
    %12 = tpu.matmul %10, %11, %cst_11 {dimension_numbers = #tpu.dot_dimension_numbers<[1], [0], [0], [1], [0, 0, 1, 1], [], []>} : vector<2x32xf32>, vector<32x64xf32>, vector<2x64xf32> -> vector<2x64xf32>
    %c0_12 = arith.constant 0 : index
    %c0_13 = arith.constant 0 : index
    %13 = vector.load %arg5[%c0_12, %c0_13] : memref<1x64xf32, #tpu.memory_space<vmem>>, vector<1x64xf32>
    %14 = vector.broadcast %13 : vector<1x64xf32> to vector<2x64xf32>
    %15 = arith.addf %12, %14 : vector<2x64xf32>
    %16 = arith.negf %15 : vector<2x64xf32>
    %17 = math.exp %16 : vector<2x64xf32>
    %cst_14 = arith.constant 1.000000e+00 : f32
    %18 = vector.broadcast %cst_14 : f32 to vector<2x64xf32>
    %19 = arith.addf %18, %17 : vector<2x64xf32>
    %20 = arith.divf %18, %19 : vector<2x64xf32>
    %21 = vector.shape_cast %20 : vector<2x64xf32> to vector<2x64x1xf32>
    %22 = vector.broadcast %21 : vector<2x64x1xf32> to vector<2x64x128xf32>
    %23 = arith.mulf %0, %22 : vector<2x64x128xf32>
    %c0_15 = arith.constant 0 : index
    %c0_16 = arith.constant 0 : index
    %c0_17 = arith.constant 0 : index
    %24 = vector.load %arg6[%c0_15, %c0_16, %c0_17] : memref<2x64x128xf32, #tpu.memory_space<vmem>>, vector<2x64x128xf32>
    tpu.vector_store %arg6[%c0_15, %c0_16, %c0_17], %23 {strides = array<i32>} : memref<2x64x128xf32, #tpu.memory_space<vmem>>, vector<2x64x128xf32>,
    return
  }
  func.func @transform_0(%arg0: i32) -> (i32, i32, i32) {
    %c0_i32 = arith.constant 0 : i32
    %c0_i32_0 = arith.constant 0 : i32
    %c0_i32_1 = arith.constant 0 : i32
    return %arg0, %c0_i32, %c0_i32_0 : i32, i32, i32
  }
  func.func @transform_1(%arg0: i32) -> (i32, i32) {
    %c0_i32 = arith.constant 0 : i32
    %c0_i32_0 = arith.constant 0 : i32
    %c0_i32_1 = arith.constant 0 : i32
    return %c0_i32, %c0_i32_0 : i32, i32
  }
  func.func @transform_2(%arg0: i32) -> (i32, i32) {
    %c0_i32 = arith.constant 0 : i32
    %c0_i32_0 = arith.constant 0 : i32
    %c0_i32_1 = arith.constant 0 : i32
    return %c0_i32, %c0_i32_0 : i32, i32
  }
  func.func @transform_3(%arg0: i32) -> (i32, i32) {
    %c0_i32 = arith.constant 0 : i32
    %c0_i32_0 = arith.constant 0 : i32
    %c0_i32_1 = arith.constant 0 : i32
    return %c0_i32, %c0_i32_0 : i32, i32
  }
  func.func @transform_4(%arg0: i32) -> (i32, i32) {
    %c0_i32 = arith.constant 0 : i32
    %c0_i32_0 = arith.constant 0 : i32
    %c0_i32_1 = arith.constant 0 : i32
    return %c0_i32, %c0_i32_0 : i32, i32
  }
  func.func @transform_5(%arg0: i32) -> (i32, i32, i32) {
    %c0_i32 = arith.constant 0 : i32
    %c0_i32_0 = arith.constant 0 : i32
    %c0_i32_1 = arith.constant 0 : i32
    return %arg0, %c0_i32, %c0_i32_0 : i32, i32, i32
  }
}

</mosaic_0001>

<bundles_post_ra>
// kernel: tpu_custom_call.1
= control target key start
LH: loop header
LB: loop body
LE: loop exit
PB: predicated region body
PF: predicated region fallthrough
CT: control target
= control target key end

     0   :  { %10 = vsyncpa [#allocation3], 0  ;;  %s1389_s0 = inlined_call_operand.hbm [shape: f32[4,64,128], index: 0, kind: input, shape index: {}]   ;;  %s1390_s1 = inlined_call_operand.vmem [shape: f32[64,32], index: 1, kind: input, shape index: {}]   ;;  %s1391_s2 = inlined_call_operand.vmem [shape: f32[1,32], index: 2, kind: input, shape index: {}]   ;;  %s1392_s3 = inlined_call_operand.vmem [shape: f32[32,64], index: 3, kind: input, shape index: {}]   ;;  %s1393_s4 = inlined_call_operand.vmem [shape: f32[1,64], index: 4, kind: input, shape index: {}]   ;;  %s1394_s5 = inlined_call_operand.hbm [shape: f32[4,64,128], index: 5, kind: output, shape index: {}]  }
   0x1   :  { %12 = vsyncpa [#allocation3 + $0x1], 0 }
   0x2   :  { %13 = vsyncpa [#allocation4], 0 }
   0x3   :  { %15 = vsyncpa [#allocation4 + $0x1], 0  ;;  %s1050_s18 = smov 0   ;;  %s1052_s19 = smov 0  }
   0x4   :  { %s1054_s20 = smov 0   ;;  %s1056_s21 = smov 0  }
   0x5 LB: > { %s1071_s22 = sadd.s32 4294967295, %s1010_s21   ;;  %s793_s23 = sadd.s32 4294967294, %s1010_s21   ;;  %s1010_s21 = sphi %s1056_s21, %s1409_s21   ;;  %s1006_s20 = sphi %s1054_s20, %s1408_s20   ;;  %s1002_s19 = sphi %s1052_s19, %s1407_s19   ;;  %s998_s18 = sphi %s1050_s18, %s1406_s18  }
   0x6   : > { %s1075_s24 = sadd.s32 1, %s1010_s21   ;;  %s28_s25 = sadd.s32 1, %s1006_s20 }
   0x7   : > { %s25_s26 = ssub.s32 %s1010_s21, %s1075_s24  ;;  %p35_p0 = scmp.ne.s32.totalorder %s1006_s20, %s1002_s19 }
   0x8   : > { %p26_p1 = scmp.eq.s32.totalorder %s25_s26, 0  ;;  %p36_p2 = scmp.eq.s32.totalorder %s1010_s21, 0 }
   0x9   : > { %p41_p3 = scmp.ne.s32.totalorder %s1002_s19, %s998_s18  ;;  %p42_p4 = scmp.eq.s32.totalorder %s1071_s22, 0 }
   0xa   : > { %s1087_s27 = scalar_select %p26_p1, %s1006_s20, %s28_s25  }
   0xb   : > { %p1089_p5 = por %p36_p2, %p35_p0  ;;  %p1093_p6 = por %p42_p4, %p41_p3 }
   0xc   : > { %p149_p7 = scmp.eq.s32.totalorder %s1071_s22, 1  ;;  %p155_p8 = scmp.eq.s32.totalorder %s793_s23, 1 }
   0xd   : > { %s1398_s29 = scalar_select %p1093_p6, 1, 0 }
   0xe   : > { %p874_p10 = scmp.lt.s32.totalorder %s1010_s21, 2  ;;  %p1100_p11 = por %p149_p7, %p35_p0 }
   0xf   : > { %p1104_p12 = por %p155_p8, %p41_p3  ;;  %s187_s7 = sand.u32 1, %s1006_s20  }
  0x10   : > { %s1399_s30 = scalar_select %p1100_p11, 1, 0 }
  0x11   : > { %s1400_s6 = scalar_select %p1104_p12, 1, 0 }
  0x12   : > { %s815_s8 = sshll.u32 %s1010_s21, 11  ;;  %s796_s9 = sshll.u32 %s187_s7, 7 }
  0x13   : > { %s1113_s12 = scalar_lea.hbm %s1389_s0, %s815_s8  ;;  %s191_s13 = scalar_lea.vmem [#allocation2], %s796_s9 }
  0x14   : > { %s199_s14 = sshll.u32 %s191_s13, 4  ;;  %p1117_p13 = pnand %p874_p10, %p1089_p5  ;;  %s1121_s14 = int_to_ptr.vmem [resolvable:$true] %s199_s14 }
  0x15   : > { %s1123_s16 = scalar_lea.sflag [#allocation3], %s187_s7  ;;  %s918_s17 = scalar_lea.hbm %s1113_s12, 2048 }
  0x16   : > { %p919_p0 = scmp.ne.s32.totalorder %s1113_s12, %s918_s17  ;;  %p920_p1 = pneg %p1117_p13 }
  0x17   : > { %s923_s26 = scalar_lea.hbm %s1389_s0, 4096  ;;  %p924_p4 = scmp.lt.s32.totalorder %s1113_s12, %s1389_s0 }
  0x18   : > { %p921_p2 = pnand %p920_p1, %p919_p0  ;;  %p925_p5 = scmp.lt.s32.totalorder %s923_s26, %s918_s17 }
  0x1a   : > { %p922_p3 = pneg %p921_p2  ;;  %p926_p7 = por %p925_p5, %p924_p4 }
  0x1c   : > { %p927_p8 = pnand %p926_p7, %p922_p3 }
  0x1e   : > { %930 = shalt.err (!%p927_p8)
}
  0x1f   : > { %s931_s7 = scalar_lea.vmem %s1121_s14, 2048  ;;  %s1012_s9 = smov [#allocation2]  }
  0x20   : > { %p932_p10 = scmp.ne.s32.totalorder %s1121_s14, %s931_s7  ;;  %s936_s10 = sshll.u32 %s1012_s9, 4  ;;  %s937_s10 = int_to_ptr.vmem [resolvable:$false] %s936_s10 }
  0x21   : > { %s938_s11 = scalar_lea.vmem %s937_s10, 4096  ;;  %p939_p2 = scmp.lt.s32.totalorder %s1121_s14, %s937_s10 }
  0x22   : > { %p934_p9 = pnand %p932_p10, %p920_p1  ;;  %p940_p12 = scmp.lt.s32.totalorder %s938_s11, %s931_s7 }
  0x24   : > { %p935_p0 = pneg %p934_p9  ;;  %p941_p11 = por %p940_p12, %p939_p2 }
  0x26   : > { %p942_p6 = pnand %p941_p11, %p935_p0 }
  0x28   : > { %945 = shalt.err (!%p942_p6)
}
  0x29   : > { %s1013_s13 = smov 128   ;;  %s1014_s17 = smov 8  }
  0x2a   : > { %869 = dma.hbm_to_vmem [thread:$0]  (!%p1117_p13), %s1113_s12, 2048, %s1121_s14, %s1123_s16, %s1013_s13, %s1013_s13, %s1014_s17  }
  0x2b   : > { %p800_p9 = scmp.ge.s32.totalorder %s1010_s21, 1  ;;  %p207_p1 = scmp.lt.s32.totalorder %s1010_s21, 3 }
  0x2d   : > { %p208_p3 = pnand %p800_p9, %p207_p1 }
  0x2e   : > { %s1147_s23 = sand.u32 (!%p208_p3), 1, %s1002_s19   ;;  %p1402_p6 = scmp.ne.s32.totalorder (!%p208_p3), %s1398_s29, 0 }
  0x2f   : > { %211 = sbr.rel (%p208_p3) target bundleno = 816 (0x330), region = 40  ;;  %s801_s25 = sshll.u32 (!%p208_p3), %s1147_s23, 7 }
  0x30   : > { %s214_s26 = scalar_lea.sflag (!%p208_p3), [#allocation3], %s1147_s23  ;;  %s1153_s28 = scalar_lea.vmem (!%p208_p3), [#allocation2], %s801_s25 }
  0x34   : > { %989 = dma.done.wait (%p1402_p6), %s214_s26, 2048  }
  0x35   : > { %991 = vsyncadd (%p1402_p6), %s214_s26, 4294965248  ;;  %v1160_v0 = vld [vmem:[%s1153_s28 + $0x40] sm:$0xff]  ;;  %v1168_v2 = vld [vmem:[%s1153_s28 + $0x48] sm:$0xff]  ;;  %v1015_v17 = vmov 0.0   ;;  %vm1016_vm0 = vmmov 0   ;;  %v342_v30 = vlaneseq  ;;  %vm353_vm1 = vcmask 130112  }
  0x36   : > { %v1163_v1 = vld [vmem:[%s1153_s28] sm:$0xff]  ;;  %278 = vadd.xlane.f32.xlu1 %v1160_v0  ;;  %v1171_v3 = vld [vmem:[%s1153_s28 + $0x8] sm:$0xff]  ;;  %v1176_v4 = vld [vmem:[%s1153_s28 + $0x50] sm:$0xff]  ;;  %832 = vmatprep.subr.mxu0 %v1015_v17  ;;  %vm360_vm2 = vcmask 195712   ;;  %vm367_vm3 = vcmask 261312   ;;  %vm374_vm4 = vcmask 326912  }
  0x37   : > { %262 = vadd.xlane.f32.xlu0 %v1163_v1  ;;  %v1179_v5 = vld [vmem:[%s1153_s28 + $0x10] sm:$0xff]  ;;  %v1184_v6 = vld [vmem:[%s1153_s28 + $0x58] sm:$0xff]  ;;  %v1192_v8 = vld [vmem:[%s1153_s28 + $0x60] sm:$0xff]  ;;  %851 = vmatprep.subr.mxu1 %v1015_v17  ;;  %v343_v33 = vand.u32 127, %v342_v30  ;;  %v1262_v34 = vshrl.u32 %v342_v30, 7  ;;  %vm381_vm5 = vcmask 392512  }
  0x38   : > { %v1187_v7 = vld [vmem:[%s1153_s28 + $0x18] sm:$0xff]  ;;  %v1195_v9 = vld [vmem:[%s1153_s28 + $0x20] sm:$0xff]  ;;  %v1200_v10 = vld [vmem:[%s1153_s28 + $0x68] sm:$0xff]  ;;  %848 = vmatprep.mubr.msk.f32.mxu0 %vm1016_vm0, %v1015_v17  ;;  %859 = vmatprep.mubr.msk.f32.mxu1 %vm1016_vm0, %v1015_v17  ;;  %vm388_vm6 = vcmask 458112   ;;  %vm395_vm7 = vcmask 523712   ;;  %vm436_vm8 = vcmask 1041409  }
  0x39   : > { %v1203_v11 = vld [vmem:[%s1153_s28 + $0x28] sm:$0xff]  ;;  %v1208_v12 = vld [vmem:[%s1153_s28 + $0x70] sm:$0xff]  ;;  %v1216_v14 = vld [vmem:[%s1153_s28 + $0x78] sm:$0xff]  ;;  %v348_v37 = vadd.s32 4294967288, %v343_v33  ;;  %v355_v38 = vadd.s32 4294967280, %v343_v33  ;;  %v362_v39 = vadd.s32 4294967272, %v343_v33  ;;  %v346_v41 = vsub.s32 %v343_v33, %v1262_v34 }
  0x3a   : > { %280 = vadd.xlane.f32.xlu1 %v1168_v2  ;;  %v1211_v13 = vld [vmem:[%s1153_s28 + $0x30] sm:$0xff]  ;;  %v1219_v15 = vld [vmem:[%s1153_s28 + $0x38] sm:$0xff]  ;;  %v316_v19 = vld [vmem:[%s1390_s1 + $0x28] sm:$0xff]  ;;  %v369_v40 = vadd.s32 4294967264, %v343_v33  ;;  %v376_v46 = vadd.s32 4294967256, %v343_v33  ;;  %v383_v48 = vadd.s32 4294967248, %v343_v33 }
  0x3b   : > { %264 = vadd.xlane.f32.xlu0 %v1171_v3  ;;  %v318_v16 = vld [vmem:[%s1390_s1 + $0x38] sm:$0xff]  ;;  %v317_v18 = vld [vmem:[%s1390_s1 + $0x30] sm:$0xff]  ;;  %v315_v20 = vld [vmem:[%s1390_s1 + $0x20] sm:$0xff]  ;;  %v351_v44 = vsub.s32 %v348_v37, %v1262_v34  ;;  %v358_v45 = vsub.s32 %v355_v38, %v1262_v34  ;;  %v365_v47 = vsub.s32 %v362_v39, %v1262_v34  ;;  %vm438_vm9 = vcmask 523264   ;;  %s1307_s29 = scalar_lea.vmem [#allocation5], %s801_s25  ;;  %s817_s25 = sshll.u32 %s1071_s22, 11 }
  0x3c   : > { %833 = vmatpush3.msra.mxu0 %v318_v16  ;;  %v314_v21 = vld [vmem:[%s1390_s1 + $0x18] sm:$0xff]  ;;  %v313_v22 = vld [vmem:[%s1390_s1 + $0x10] sm:$0xff]  ;;  %v312_v23 = vld [vmem:[%s1390_s1 + $0x8] sm:$0xff]  ;;  %v372_v51 = vsub.s32 %v369_v40, %v1262_v34  ;;  %v379_v60 = vsub.s32 %v376_v46, %v1262_v34  ;;  %v386_v63 = vsub.s32 %v383_v48, %v1262_v34  ;;  %v390_v16 = vadd.s32 4294967240, %v343_v33  ;;  %s720_s12 = sshll.u32 %s1307_s29, 4  ;;  %s1342_s16 = scalar_lea.hbm %s1394_s5, %s817_s25  ;;  %s1344_s12 = int_to_ptr.vmem [resolvable:$true] %s720_s12 }
  0x3d   : > { %834 = vmatprep.subr.mxu0 %v1015_v17  ;;  %v311_v24 = vld [vmem:[%s1390_s1] sm:$0xff]  ;;  %v515_v25 = vld [vmem:[%s1392_s3 + $0x18] sm:$0xff]  ;;  %vm523_vm10 = vcmask 261120   ;;  %s706_s8 = scalar_lea.sflag [#allocation4], %s1147_s23  ;;  %s946_s7 = scalar_lea.vmem %s1344_s12, 2048 }
  0x3e   : > { %282 = vadd.xlane.f32.xlu1 %v1176_v4  ;;  %835 = vmatpush3.msra.mxu0 %v317_v18  ;;  %p947_p11 = scmp.ne.s32.totalorder %s1344_s12, %s946_s7  ;;  %p1403_p12 = scmp.ne.s32.totalorder %s1399_s30, 0 }
  0x3f   : > { %266 = vadd.xlane.f32.xlu0 %v1179_v5  ;;  %836 = vmatprep.subr.mxu0 %v1015_v17  ;;  %s1017_s22 = smov [#allocation5]  }
  0x40   : > { %837 = vmatpush3.msra.mxu0 %v316_v19  ;;  %852 = vmatpush3.msra.mxu1 %v515_v25  ;;  %p948_p13 = pnand %p947_p11, %p1403_p12  ;;  %s950_s9 = sshll.u32 %s1017_s22, 4  ;;  %s951_s9 = int_to_ptr.vmem [resolvable:$false] %s950_s9 }
  0x41   : > { %838 = vmatprep.subr.mxu0 %v1015_v17  ;;  %853 = vmatprep.subr.mxu1 %v1015_v17  ;;  %s952_s10 = scalar_lea.vmem %s951_s9, 4096  ;;  %p953_p5 = scmp.lt.s32.totalorder %s1344_s12, %s951_s9 }
  0x42   : > { %284 = vadd.xlane.f32.xlu1 %v1184_v6  ;;  %839 = vmatpush3.msra.mxu0 %v315_v20  ;;  %p949_p4 = pneg %p948_p13  ;;  %p954_p7 = scmp.lt.s32.totalorder %s952_s10, %s946_s7 }
  0x43   : > { %268 = vadd.xlane.f32.xlu0 %v1187_v7  ;;  %840 = vmatprep.subr.mxu0 %v1015_v17 }
  0x44   : > { %841 = vmatpush3.msra.mxu0 %v314_v21  ;;  %p955_p8 = por %p954_p7, %p953_p5 }
  0x45   : > { %842 = vmatprep.subr.mxu0 %v1015_v17 }
  0x46   : > { %286 = vadd.xlane.f32.xlu1 %v1192_v8  ;;  %843 = vmatpush3.msra.mxu0 %v313_v22  ;;  %p956_p10 = pnand %p955_p8, %p949_p4 }
  0x47   : > { %270 = vadd.xlane.f32.xlu0 %v1195_v9  ;;  %844 = vmatprep.subr.mxu0 %v1015_v17 }
  0x48   : > { %845 = vmatpush3.msra.mxu0 %v312_v23 }
  0x49   : > { %846 = vmatprep.subr.mxu0 %v1015_v17 }
  0x4a   : > { %288 = vadd.xlane.f32.xlu1 %v1200_v10  ;;  %847 = vmatpush3.msra.mxu0 %v311_v24 }
  0x4b   : > { %272 = vadd.xlane.f32.xlu0 %v1203_v11 }
  0x4e   : > { %290 = vadd.xlane.f32.xlu1 %v1208_v12 }
  0x4f   : > { %274 = vadd.xlane.f32.xlu0 %v1211_v13 }
  0x52   : > { %292 = vadd.xlane.f32.xlu1 %v1216_v14 }
  0x53   : > { %276 = vadd.xlane.f32.xlu0 %v1219_v15 }
  0xbf   : > { %v279_v26 = vpop.xlane.xlu1 %278 }
  0xc0   : > { %v263_v27 = vpop.xlane.xlu0 %262  ;;  %v303_v52 = vmul.f32 0.0078125, %v279_v26 }
  0xc1   : > { %v295_v53 = vmul.f32 0.0078125, %v263_v27 }
  0xc2   : > { %v400_v22 = vrot.slane %v303_v52, %v346_v41 }
  0xc3   : > { %v281_v28 = vpop.xlane.xlu1 %280  ;;  %v347_v23 = vrot.slane %v295_v53, %v346_v41 }
  0xc4   : > { %v265_v29 = vpop.xlane.xlu0 %264  ;;  %v304_v49 = vmul.f32 0.0078125, %v281_v28 }
  0xc5   : > { %v296_v50 = vmul.f32 0.0078125, %v265_v29 }
  0xc6   : > { %v404_v18 = vrot.slane %v304_v49, %v351_v44 }
  0xc7   : > { %v283_v31 = vpop.xlane.xlu1 %282  ;;  %v352_v19 = vrot.slane %v296_v50, %v351_v44 }
  0xc8   : > { %v267_v32 = vpop.xlane.xlu0 %266  ;;  %v305_v54 = vmul.f32 0.0078125, %v283_v31  ;;  %v405_v33 = vsel %vm353_vm1, %v404_v18, %v400_v22  ;;  %v805_v22 = vld [vmem:[%s1393_s4] ss:$0 sm:$0xff] }
  0xc9   : > { %v297_v55 = vmul.f32 0.0078125, %v267_v32  ;;  %v354_v37 = vsel %vm353_vm1, %v352_v19, %v347_v23 }
  0xca   : > { %v409_v24 = vrot.slane %v305_v54, %v358_v45 }
  0xcb   : > { %v285_v35 = vpop.xlane.xlu1 %284  ;;  %v359_v25 = vrot.slane %v297_v55, %v358_v45 }
  0xcc   : > { %v269_v36 = vpop.xlane.xlu0 %268  ;;  %v306_v58 = vmul.f32 0.0078125, %v285_v35  ;;  %v410_v40 = vsel %vm360_vm2, %v409_v24, %v405_v33 }
  0xcd   : > { %v298_v59 = vmul.f32 0.0078125, %v269_v36  ;;  %v393_v36 = vsub.s32 %v390_v16, %v1262_v34  ;;  %v361_v41 = vsel %vm360_vm2, %v359_v25, %v354_v37  ;;  %v803_v16 = vld [vmem:[%s1391_s2] ss:$0 sm:$0xff] }
  0xce   : > { %v414_v28 = vrot.slane %v306_v58, %v365_v47 }
  0xcf   : > { %v287_v42 = vpop.xlane.xlu1 %286  ;;  %v366_v29 = vrot.slane %v298_v59, %v365_v47 }
  0xd0   : > { %v271_v43 = vpop.xlane.xlu0 %270  ;;  %v307_v61 = vmul.f32 0.0078125, %v287_v42  ;;  %v415_v46 = vsel %vm367_vm3, %v414_v28, %v410_v40  ;;  %v605_v28 = vsub.s32 0, %v1262_v34 }
  0xd1   : > { %v299_v62 = vmul.f32 0.0078125, %v271_v43  ;;  %v368_v47 = vsel %vm367_vm3, %v366_v29, %v361_v41 }
  0xd2   : > { %v419_v32 = vrot.slane %v307_v61, %v372_v51  ;;  %v514_v61 = vld [vmem:[%s1392_s3 + $0x10] sm:$0xff] }
  0xd3   : > { %v289_v56 = vpop.xlane.xlu1 %288  ;;  %v373_v35 = vrot.slane %v299_v62, %v372_v51  ;;  %854 = vmatpush3.msra.mxu1 %v514_v61  ;;  %v513_v62 = vld [vmem:[%s1392_s3 + $0x8] sm:$0xff] }
  0xd4   : > { %v273_v57 = vpop.xlane.xlu0 %272  ;;  %v308_v20 = vmul.f32 0.0078125, %v289_v56  ;;  %v420_v50 = vsel %vm374_vm4, %v419_v32, %v415_v46  ;;  %855 = vmatprep.subr.mxu1 %v1015_v17 }
  0xd5   : > { %v300_v21 = vmul.f32 0.0078125, %v273_v57  ;;  %v375_v51 = vsel %vm374_vm4, %v373_v35, %v368_v47  ;;  %856 = vmatpush3.msra.mxu1 %v513_v62 }
  0xd6   : > { %v424_v38 = vrot.slane %v308_v20, %v379_v60  ;;  %857 = vmatprep.subr.mxu1 %v1015_v17 }
  0xd7   : > { %v291_v26 = vpop.xlane.xlu1 %290  ;;  %v380_v39 = vrot.slane %v300_v21, %v379_v60 }
  0xd8   : > { %v275_v27 = vpop.xlane.xlu0 %274  ;;  %v309_v30 = vmul.f32 0.0078125, %v291_v26  ;;  %v425_v52 = vsel %vm381_vm5, %v424_v38, %v420_v50 }
  0xd9   : > { %v301_v31 = vmul.f32 0.0078125, %v275_v27  ;;  %v382_v53 = vsel %vm381_vm5, %v380_v39, %v375_v51 }
  0xda   : > { %v429_v42 = vrot.slane %v309_v30, %v386_v63 }
  0xdb   : > { %v387_v43 = vrot.slane %v301_v31, %v386_v63  ;;  %v293_v44 = vpop.xlane.xlu1 %292  ;;  %v512_v63 = vld [vmem:[%s1392_s3] sm:$0xff]  ;;  %v640_v31 = vsub.s32 1, %v1262_v34 }
  0xdc   : > { %v277_v45 = vpop.xlane.xlu0 %276  ;;  %v310_v48 = vmul.f32 0.0078125, %v293_v44  ;;  %v430_v56 = vsel %vm388_vm6, %v429_v42, %v425_v52  ;;  %858 = vmatpush3.msra.mxu1 %v512_v63 }
  0xdd   : > { %v302_v49 = vmul.f32 0.0078125, %v277_v45  ;;  %v389_v57 = vsel %vm388_vm6, %v387_v43, %v382_v53 }
  0xde   : > { %v434_v54 = vrot.slane %v310_v48, %v393_v36 }
  0xdf   : > { %v394_v55 = vrot.slane %v302_v49, %v393_v36 }
  0xe0   : > { %v435_v59 = vsel %vm395_vm7, %v434_v54, %v430_v56 }
  0xe1   : > { %v396_v58 = vsel %vm395_vm7, %v394_v55, %v389_v57 }
  0xe2   : > { %v437_v60 = vsel %vm436_vm8, %v435_v59, %v396_v58 }
  0xe3   : > { %849 = vmatmul.mubr.msk.f32.vlgmr.msra.gmra.mxu0 %vm438_vm9, %v437_v60 }
 0x1a3   : > { %v507_v18 = vpop.f32.mrf.mxu0 }
 0x1a4   : > { %v508_v19 = vadd.f32 %v803_v16, %v507_v18 }
 0x1a5   : > { %v850_v20 = vpop.f32.mrf.mxu0 }
 0x1a6   : > { %v511_v21 = vmax.f32 %v508_v19, 0.0 }
 0x1a8   : > { %860 = vmatmul.mubr.msk.f32.vlgmr.msra.gmra.mxu1 %vm523_vm10, %v511_v21 }
 0x268   : > { %v593_v17 = vpop.f32.mrf.mxu1 }
 0x269   : > { %v594_v23 = vadd.f32 %v805_v22, %v593_v17 }
 0x26a   : > { %v861_v24 = vpop.f32.mrf.mxu1 }
 0x26b   : > { %v807_v25 = vmul.f32 -1.442695, %v594_v23 }
 0x26d   : > { %914 = vpow2.f32 %v807_v25 }
 0x27a   : > { %v915_v26 = vpop.eup %914 }
 0x27b   : > { %v600_v27 = vadd.f32 1.0, %v915_v26 }
 0x27d   : > { %916 = vrcp.f32 %v600_v27 }
 0x28a   : > { %v917_v29 = vpop.eup %916 }
 0x28b   : > { %v606_v30 = vrot.slane %v917_v29, %v605_v28  ;;  %v641_v32 = vrot.slane %v917_v29, %v640_v31 }
 0x28d   : > { %612 = vbcast.lane.b32.xlu1 %v606_v30, 264  ;;  %608 = vbcast.lane.b32.xlu0 %v606_v30, 256 }
 0x291   : > { %616 = vbcast.lane.b32.xlu1 %v606_v30, 272  ;;  %624 = vbcast.lane.b32.xlu0 %v606_v30, 288 }
 0x295   : > { %620 = vbcast.lane.b32.xlu1 %v606_v30, 280  ;;  %632 = vbcast.lane.b32.xlu0 %v606_v30, 304 }
 0x299   : > { %628 = vbcast.lane.b32.xlu1 %v606_v30, 296  ;;  %643 = vbcast.lane.b32.xlu0 %v641_v32, 256 }
 0x29d   : > { %636 = vbcast.lane.b32.xlu1 %v606_v30, 312  ;;  %651 = vbcast.lane.b32.xlu0 %v641_v32, 272 }
 0x2a1   : > { %647 = vbcast.lane.b32.xlu1 %v641_v32, 264  ;;  %659 = vbcast.lane.b32.xlu0 %v641_v32, 288 }
 0x2a5   : > { %655 = vbcast.lane.b32.xlu1 %v641_v32, 280  ;;  %667 = vbcast.lane.b32.xlu0 %v641_v32, 304 }
 0x2a9   : > { %663 = vbcast.lane.b32.xlu1 %v641_v32, 296 }
 0x2ad   : > { %671 = vbcast.lane.b32.xlu1 %v641_v32, 312 }
 0x2ff   : > { %v613_v35 = vpop.permute.xlu1 %612  ;;  %v609_v36 = vpop.permute.xlu0 %608 }
 0x300   : > { %v674_v33 = vmul.f32 %v613_v35, %v1171_v3  ;;  %v673_v34 = vmul.f32 %v609_v36, %v1163_v1 }
 0x302   : > { %690 = vst [vmem:[%s1307_s29 + $0x8] sm:$0xff] %v674_v33  ;;  %689 = vst [vmem:[%s1307_s29] sm:$0xff] %v673_v34 }
 0x303   : > { %v617_v37 = vpop.permute.xlu1 %616  ;;  %v625_v38 = vpop.permute.xlu0 %624 }
 0x304   : > { %v675_v39 = vmul.f32 %v617_v37, %v1179_v5  ;;  %v677_v3 = vmul.f32 %v625_v38, %v1195_v9 }
 0x306   : > { %691 = vst [vmem:[%s1307_s29 + $0x10] sm:$0xff] %v675_v39  ;;  %693 = vst [vmem:[%s1307_s29 + $0x20] sm:$0xff] %v677_v3 }
 0x307   : > { %v621_v1 = vpop.permute.xlu1 %620  ;;  %v633_v40 = vpop.permute.xlu0 %632 }
 0x308   : > { %v676_v41 = vmul.f32 %v621_v1, %v1187_v7  ;;  %v679_v42 = vmul.f32 %v633_v40, %v1211_v13 }
 0x30a   : > { %692 = vst [vmem:[%s1307_s29 + $0x18] sm:$0xff] %v676_v41  ;;  %695 = vst [vmem:[%s1307_s29 + $0x30] sm:$0xff] %v679_v42 }
 0x30b   : > { %v629_v43 = vpop.permute.xlu1 %628  ;;  %v644_v44 = vpop.permute.xlu0 %643 }
 0x30c   : > { %v678_v5 = vmul.f32 %v629_v43, %v1203_v11  ;;  %v681_v9 = vmul.f32 %v644_v44, %v1160_v0 }
 0x30e   : > { %694 = vst [vmem:[%s1307_s29 + $0x28] sm:$0xff] %v678_v5  ;;  %697 = vst [vmem:[%s1307_s29 + $0x40] sm:$0xff] %v681_v9 }
 0x30f   : > { %v637_v45 = vpop.permute.xlu1 %636  ;;  %v652_v46 = vpop.permute.xlu0 %651 }
 0x310   : > { %v680_v7 = vmul.f32 %v637_v45, %v1219_v15  ;;  %v683_v13 = vmul.f32 %v652_v46, %v1176_v4 }
 0x312   : > { %696 = vst [vmem:[%s1307_s29 + $0x38] sm:$0xff] %v680_v7  ;;  %699 = vst [vmem:[%s1307_s29 + $0x50] sm:$0xff] %v683_v13 }
 0x313   : > { %v648_v47 = vpop.permute.xlu1 %647  ;;  %v660_v48 = vpop.permute.xlu0 %659 }
 0x314   : > { %v682_v11 = vmul.f32 %v648_v47, %v1168_v2  ;;  %v685_v0 = vmul.f32 %v660_v48, %v1192_v8 }
 0x316   : > { %698 = vst [vmem:[%s1307_s29 + $0x48] sm:$0xff] %v682_v11  ;;  %701 = vst [vmem:[%s1307_s29 + $0x60] sm:$0xff] %v685_v0 }
 0x317   : > { %v656_v49 = vpop.permute.xlu1 %655  ;;  %v668_v50 = vpop.permute.xlu0 %667 }
 0x318   : > { %v684_v15 = vmul.f32 %v656_v49, %v1184_v6  ;;  %v687_v4 = vmul.f32 %v668_v50, %v1208_v12 }
 0x31a   : > { %700 = vst [vmem:[%s1307_s29 + $0x58] sm:$0xff] %v684_v15  ;;  %703 = vst [vmem:[%s1307_s29 + $0x70] sm:$0xff] %v687_v4 }
 0x31b   : > { %v664_v51 = vpop.permute.xlu1 %663 }
 0x31c   : > { %v686_v52 = vmul.f32 %v664_v51, %v1200_v10 }
 0x31e   : > { %702 = vst [vmem:[%s1307_s29 + $0x68] sm:$0xff] %v686_v52 }
 0x31f   : > { %v672_v2 = vpop.permute.xlu1 %671 }
 0x320   : > { %v688_v6 = vmul.f32 %v672_v2, %v1216_v14 }
 0x322   : > { %704 = vst [vmem:[%s1307_s29 + $0x78] sm:$0xff] %v688_v6 }
 0x323   : > { %959 = shalt.err (!%p956_p10)
}
 0x324   : > { %s960_s11 = scalar_lea.hbm %s1342_s16, 2048  ;;  %s964_s26 = scalar_lea.hbm %s1394_s5, 4096 }
 0x325   : > { %p961_p0 = scmp.ne.s32.totalorder %s1342_s16, %s960_s11  ;;  %p965_p1 = scmp.lt.s32.totalorder %s1342_s16, %s1394_s5 }
 0x326   : > { %p966_p3 = scmp.lt.s32.totalorder %s964_s26, %s960_s11 }
 0x327   : > { %p962_p2 = pnand %p961_p0, %p1403_p12 }
 0x328   : > { %p967_p6 = por %p966_p3, %p965_p1 }
 0x329   : > { %p963_p9 = pneg %p962_p2 }
 0x32b   : > { %p968_p11 = pnand %p967_p6, %p963_p9 }
 0x32d   : > { %971 = shalt.err (!%p968_p11)
}
 0x32e   : > { %s1018_s25 = smov 128   ;;  %s1019_s14 = smov 8  }
 0x32f   : > { %864 = dma.vmem_to_hbm [thread:$0]  (%p1403_p12), %s1344_s12, 2048, %s1342_s16, %s706_s8, %s1018_s25, %s1018_s25, %s1019_s14  }
 0x330 PF: > { %s735_s15 = sand.u32 1, %s998_s18   ;;  %p1404_p13 = scmp.ne.s32.totalorder %s1400_s6, 0 }
 0x331   : > { %p1405_p4 = scmp.ge.s32.totalorder %s1010_s21, 2  ;;  %s736_s7 = scalar_lea.sflag [#allocation4], %s735_s15 }
 0x333   : > { %p871_p5 = pnand %p1405_p4, %p1404_p13 }
 0x335   : > { %p872_p7 = pneg %p871_p5 }
 0x337   : > { %993 = dma.done.wait (%p872_p7), %s736_s7, 2048  }
 0x338   : > { %995 = vsyncadd (%p872_p7), %s736_s7, 4294965248  ;;  %p18_p8 = scmp.ge.s32.totalorder %s1075_s24, 4   ;;  %s1406_s18 = smov %s1002_s19 }
 0x339   : > { %s1407_s19 = smov %s1006_s20  ;;  %s1408_s20 = smov %s1087_s27 }
 0x33a   : > { %s1409_s21 = smov %s1075_s24  ;;  %20 = sbr.rel (!%p18_p8) target bundleno = 5 (0x5), region = 85 }
 0x33f   :  { %741 = vsyncpa [#allocation3], 1 }
 0x340   :  { %743 = vsyncpa [#allocation3 + $0x1], 1 }
 0x341   :  { %744 = vsyncpa [#allocation4], 1 }
 0x342   :  { %746 = vsyncpa [#allocation4 + $0x1], 1 }

</bundles_post_ra>
